<compile_context>
chip_gen: v7x
topology: tpu7x:2x2x1
jax: 0.10.0
libtpu: 0.0.40
codegen_flags: <defaults>
</compile_context>

<pallas_src>
import math
import functools

import jax
import jax.numpy as jnp
from jax.experimental import pallas as pl
from jax.experimental.pallas import tpu as pltpu


# --------------------------------------------------------------------------
# Hardware-aware knobs
# --------------------------------------------------------------------------
@functools.lru_cache(maxsize=1)
def _vmem_limit_bytes():
    """~80% of the chip's VMEM (leaves compiler headroom on v7x, ~100MiB on v5e/v6e)."""
    try:
        cap = pltpu.get_tpu_info().vmem_capacity_bytes
        return int(cap * 0.8)
    except Exception:
        pass
    try:
        kind = jax.devices()[0].device_kind.lower()
    except Exception:
        kind = ""
    if "v7" in kind:
        return 48 * 1024 * 1024
    return 100 * 1024 * 1024


_BUFFERED_OK = None


def _buffered_weight_supported():
    """Probe once whether pipeline_mode=pl.Buffered(1) compiles on this jax/TPU."""
    global _BUFFERED_OK
    if _BUFFERED_OK is not None:
        return _BUFFERED_OK
    try:
        def _probe(w_ref, x_ref, o_ref):
            o_ref[...] = x_ref[...] + w_ref[...]

        w = jnp.ones((8, 128), jnp.float32)
        x = jnp.zeros((16, 128), jnp.float32)
        out = pl.pallas_call(
            _probe,
            out_shape=jax.ShapeDtypeStruct((16, 128), jnp.float32),
            grid=(2,),
            in_specs=[
                pl.BlockSpec((8, 128), lambda i: (0, 0),
                             pipeline_mode=pl.Buffered(1)),
                pl.BlockSpec((8, 128), lambda i: (i, 0)),
            ],
            out_specs=pl.BlockSpec((8, 128), lambda i: (i, 0)),
        )(w, x)
        jax.block_until_ready(out)
        _BUFFERED_OK = True
    except Exception:
        _BUFFERED_OK = False
    return _BUFFERED_OK


def _const_spec(shape, ndim, buffered):
    """BlockSpec for a whole-array operand whose block index never changes."""
    idx = lambda b, i, _n=ndim: (0,) * _n
    if buffered:
        # Single-buffer constant blocks: no dead 2x VMEM for weights.
        return pl.BlockSpec(shape, idx, pipeline_mode=pl.Buffered(1))
    return pl.BlockSpec(shape, idx)


def _choose_q_tile(S, max_tile):
    """Largest query tile <= max_tile that divides S (S itself for short sequences)."""
    if S <= max_tile:
        return S
    for cand in (512, 384, 256, 128, 64, 32, 16, 8):
        if cand <= max_tile and S % cand == 0:
            return cand
    return S


# --------------------------------------------------------------------------
# Kernel 1: K/V projection (each sequence block computed exactly once)
# --------------------------------------------------------------------------
def _kv_proj_kernel(n_heads, x_ref, wk_ref, bk_ref, wv_ref, bv_ref, k_ref, v_ref):
    xb = x_ref[0].astype(jnp.bfloat16)                       # (ts, H)
    for h in range(n_heads):                                  # small & static
        kh = jnp.dot(xb, wk_ref[h], preferred_element_type=jnp.float32) + bk_ref[h]
        vh = jnp.dot(xb, wv_ref[h], preferred_element_type=jnp.float32) + bv_ref[h]
        k_ref[0, h] = kh.astype(jnp.bfloat16)                 # (ts, hd)
        v_ref[0, h] = vh.astype(jnp.bfloat16)


# --------------------------------------------------------------------------
# Kernel 2: attention + FFN + layernorms per (batch, query block)
# --------------------------------------------------------------------------
def _attn_ffn_kernel(n_heads, eps,
                     xq_ref, k_ref, v_ref, bias_ref,
                     wq_ref, bq_ref, wo_ref, bo_ref,
                     g1_ref, be1_ref, w1_ref, b1_ref, w2_ref, b2_ref,
                     g2_ref, be2_ref, o_ref):
    xq = xq_ref[0]                                            # (tq, H) f32 residual
    xq_b = xq.astype(jnp.bfloat16)
    bias = bias_ref[0, 0]                                     # (1, S) f32 additive mask

    tq, H = xq.shape
    attn_out = jnp.zeros((tq, H), jnp.float32)                # full-width f32 accumulator

    for h in range(n_heads):                                  # static unroll (n_heads small)
        # Q projection per head; 1/sqrt(head_dim) already folded into wq/bq.
        q_h = jnp.dot(xq_b, wq_ref[h], preferred_element_type=jnp.float32) + bq_ref[h]
        # energy: contract last dims of Q_h and K_h -> no explicit transpose.
        e = jax.lax.dot_general(
            q_h.astype(jnp.bfloat16), k_ref[0, h],
            (((1,), (1,)), ((), ())),
            preferred_element_type=jnp.float32)               # (tq, S)
        e = e + bias
        p = jnp.exp(e - jnp.max(e, axis=-1, keepdims=True))
        # approx reciprocal (EUP): ~1e-3 rel. error, fine for inference.
        p = p * pl.reciprocal(jnp.sum(p, axis=-1, keepdims=True), approx=True)
        ctx = jnp.dot(p.astype(jnp.bfloat16), v_ref[0, h],
                      preferred_element_type=jnp.float32)     # (tq, hd)
        # Accumulate output projection per head into the lane-dense (tq, H) value.
        attn_out = attn_out + jnp.dot(ctx.astype(jnp.bfloat16), wo_ref[h],
                                      preferred_element_type=jnp.float32)
    attn_out = attn_out + bo_ref[0]

    # ---- residual + LayerNorm 1 (f32) -----------------------------------
    y = xq + attn_out
    mu = jnp.mean(y, axis=-1, keepdims=True)
    var = jnp.mean((y - mu) ** 2, axis=-1, keepdims=True)
    y = (y - mu) * jax.lax.rsqrt(var + eps) * g1_ref[0] + be1_ref[0]

    # ---- position-wise feed-forward (bf16 matmuls, f32 accum) ------------
    hmid = jnp.maximum(
        jnp.dot(y.astype(jnp.bfloat16), w1_ref[...],
                preferred_element_type=jnp.float32) + b1_ref[0], 0.0)
    ff = jnp.dot(hmid.astype(jnp.bfloat16), w2_ref[...],
                 preferred_element_type=jnp.float32) + b2_ref[0]

    # ---- residual + LayerNorm 2 ------------------------------------------
    z = y + ff
    mu2 = jnp.mean(z, axis=-1, keepdims=True)
    var2 = jnp.mean((z - mu2) ** 2, axis=-1, keepdims=True)
    z = (z - mu2) * jax.lax.rsqrt(var2 + eps) * g2_ref[0] + be2_ref[0]

    o_ref[0] = z.astype(o_ref.dtype)


# --------------------------------------------------------------------------
# Per-layer wrapper
# --------------------------------------------------------------------------
def encoder_layer_forward(x, bias, layer_params, n_heads):
    B, S, H = x.shape
    assert H % n_heads == 0
    hd = H // n_heads
    vmem_limit = _vmem_limit_bytes()
    tq = _choose_q_tile(S, 512 if vmem_limit >= 96 * 1024 * 1024 else 256)
    nq = S // tq if S % tq == 0 else 1
    if S % tq != 0:
        tq = S

    p = layer_params
    inv_scale = 1.0 / math.sqrt(hd)

    # Head-major weight layout; MXU operands in bf16, biases/gains in f32.
    # NOTE: production configs should keep head_dim a multiple of 128 for fully
    # lane-dense stores; smaller head_dim is correct but uses masked lanes.
    wq3 = (p["wq"] * inv_scale).reshape(H, n_heads, hd).transpose(1, 0, 2).astype(jnp.bfloat16)
    bq3 = (p["bq"] * inv_scale).reshape(n_heads, 1, hd)
    wk3 = p["wk"].reshape(H, n_heads, hd).transpose(1, 0, 2).astype(jnp.bfloat16)
    bk3 = p["bk"].reshape(n_heads, 1, hd)
    wv3 = p["wv"].reshape(H, n_heads, hd).transpose(1, 0, 2).astype(jnp.bfloat16)
    bv3 = p["bv"].reshape(n_heads, 1, hd)
    wo3 = p["wo"].reshape(n_heads, hd, H).astype(jnp.bfloat16)
    w1b = p["w1"].astype(jnp.bfloat16)
    w2b = p["w2"].astype(jnp.bfloat16)

    buffered = _buffered_weight_supported()
    cparams = pltpu.CompilerParams(
        dimension_semantics=("parallel", "parallel"),
        vmem_limit_bytes=vmem_limit)

    # ---- pallas_call #1: K/V projection (once per (batch, seq block)) ------
    kv_weights = [wk3, bk3, wv3, bv3]
    kv_in_specs = [pl.BlockSpec((1, tq, H), lambda b, si: (b, si, 0))]
    kv_in_specs += [_const_spec(w.shape, w.ndim, buffered) for w in kv_weights]
    k_bf, v_bf = pl.pallas_call(
        functools.partial(_kv_proj_kernel, n_heads),
        out_shape=(jax.ShapeDtypeStruct((B, n_heads, S, hd), jnp.bfloat16),
                   jax.ShapeDtypeStruct((B, n_heads, S, hd), jnp.bfloat16)),
        grid=(B, nq),
        in_specs=kv_in_specs,
        out_specs=(pl.BlockSpec((1, n_heads, tq, hd), lambda b, si: (b, 0, si, 0)),
                   pl.BlockSpec((1, n_heads, tq, hd), lambda b, si: (b, 0, si, 0))),
        compiler_params=cparams,
    )(x, *kv_weights)

    # ---- pallas_call #2: attention + FFN per (batch, query block) ----------
    weights = [wq3, bq3, wo3, p["bo"], p["g1"], p["be1"],
               w1b, p["b1"], w2b, p["b2"], p["g2"], p["be2"]]
    in_specs = [
        pl.BlockSpec((1, tq, H), lambda b, qi: (b, qi, 0)),              # x (query block, f32)
        pl.BlockSpec((1, n_heads, S, hd), lambda b, qi: (b, 0, 0, 0)),   # K (bf16, per batch)
        pl.BlockSpec((1, n_heads, S, hd), lambda b, qi: (b, 0, 0, 0)),   # V (bf16, per batch)
        pl.BlockSpec((1, 1, 1, S), lambda b, qi: (b, 0, 0, 0)),          # additive mask bias
    ]
    in_specs += [_const_spec(w.shape, w.ndim, buffered) for w in weights]

    return pl.pallas_call(
        functools.partial(_attn_ffn_kernel, n_heads, 1e-5),
        out_shape=jax.ShapeDtypeStruct((B, S, H), x.dtype),
        grid=(B, nq),
        in_specs=in_specs,
        out_specs=pl.BlockSpec((1, tq, H), lambda b, qi: (b, qi, 0)),
        compiler_params=cparams,
    )(x, k_bf, v_bf, bias, *weights)


# --------------------------------------------------------------------------
# Parameters + full encoder forward
# --------------------------------------------------------------------------
def init_encoder_params(key, input_dim, hid_dim, n_layers, n_heads, pf_dim,
                        max_length=100):
    keys = jax.random.split(key, 2 + n_layers)
    params = {
        "tok_emb": 0.02 * jax.random.normal(keys[0], (input_dim, hid_dim), jnp.float32),
        "pos_emb": 0.02 * jax.random.normal(keys[1], (max_length, hid_dim), jnp.float32),
        "layers": [],
    }

    def linear(k, din, dout):
        k1, k2 = jax.random.split(k)
        bound = 1.0 / math.sqrt(din)
        w = jax.random.uniform(k1, (din, dout), jnp.float32, -bound, bound)
        b = jax.random.uniform(k2, (1, dout), jnp.float32, -bound, bound)
        return w, b

    for i in range(n_layers):
        lk = jax.random.split(keys[2 + i], 6)
        wq, bq = linear(lk[0], hid_dim, hid_dim)
        wk, bk = linear(lk[1], hid_dim, hid_dim)
        wv, bv = linear(lk[2], hid_dim, hid_dim)
        wo, bo = linear(lk[3], hid_dim, hid_dim)
        w1, b1 = linear(lk[4], hid_dim, pf_dim)
        w2, b2 = linear(lk[5], pf_dim, hid_dim)
        params["layers"].append(dict(
            wq=wq, bq=bq, wk=wk, bk=bk, wv=wv, bv=bv, wo=wo, bo=bo,
            g1=jnp.ones((1, hid_dim), jnp.float32),
            be1=jnp.zeros((1, hid_dim), jnp.float32),
            w1=w1, b1=b1, w2=w2, b2=b2,
            g2=jnp.ones((1, hid_dim), jnp.float32),
            be2=jnp.zeros((1, hid_dim), jnp.float32),
        ))
    return params


def encoder_forward(params, src, src_mask, n_heads):
    """Pallas-backed Encoder.forward. Embedding gather is plain-JAX glue."""
    # TODO(synk): dropout is the identity (inference); no RNG plumbed in.
    B, S = src.shape
    H = params["tok_emb"].shape[1]
    scale = math.sqrt(H)
    pos = jnp.broadcast_to(jnp.arange(S)[None, :], (B, S))
    x = params["tok_emb"][src] * scale + params["pos_emb"][pos]
    # Additive -1e10 mask bias computed once on the host (f32, reused by all layers).
    bias = jnp.where(src_mask == 0, jnp.float32(-1.0e10), jnp.float32(0.0))
    for lp in params["layers"]:
        x = encoder_layer_forward(x, bias, lp, n_heads)
    return x


# ---------------- pure-JAX f32 reference (for correctness check) -----------------
def _ref_layer(x, mask, p, n_heads):
    B, S, H = x.shape
    hd = H // n_heads
    q = x @ p["wq"] + p["bq"][0]
    k = x @ p["wk"] + p["bk"][0]
    v = x @ p["wv"] + p["bv"][0]
    q = q.reshape(B, S, n_heads, hd).transpose(0, 2, 1, 3)
    k = k.reshape(B, S, n_heads, hd).transpose(0, 2, 1, 3)
    v = v.reshape(B, S, n_heads, hd).transpose(0, 2, 1, 3)
    energy = jnp.einsum("bhqd,bhkd->bhqk", q, k) * (1.0 / math.sqrt(hd))
    energy = jnp.where(mask == 0, -1.0e10, energy)
    attn = jax.nn.softmax(energy, axis=-1)
    o = jnp.einsum("bhqk,bhkd->bhqd", attn, v).transpose(0, 2, 1, 3).reshape(B, S, H)
    o = o @ p["wo"] + p["bo"][0]

    def ln(t, g, b):
        mu = t.mean(-1, keepdims=True)
        var = ((t - mu) ** 2).mean(-1, keepdims=True)
        return (t - mu) * jax.lax.rsqrt(var + 1e-5) * g[0] + b[0]

    y = ln(x + o, p["g1"], p["be1"])
    ff = jnp.maximum(y @ p["w1"] + p["b1"][0], 0.0) @ p["w2"] + p["b2"][0]
    return ln(y + ff, p["g2"], p["be2"])


def _ref_encoder(params, src, src_mask, n_heads):
    B, S = src.shape
    H = params["tok_emb"].shape[1]
    pos = jnp.broadcast_to(jnp.arange(S)[None, :], (B, S))
    x = params["tok_emb"][src] * math.sqrt(H) + params["pos_emb"][pos]
    for lp in params["layers"]:
        x = _ref_layer(x, src_mask, lp, n_heads)
    return x


if __name__ == "__main__":
    # Small config: vocab=50, hid=32, 2 layers, 4 heads, pf=64, batch=2, seq=8.
    INPUT_DIM, HID_DIM, N_LAYERS, N_HEADS, PF_DIM, MAX_LEN = 50, 32, 2, 4, 64, 100
    B, S = 2, 8
    PAD_IDX = 0

    key = jax.random.PRNGKey(0)
    pkey, skey = jax.random.split(key)
    params = init_encoder_params(pkey, INPUT_DIM, HID_DIM, N_LAYERS, N_HEADS,
                                 PF_DIM, MAX_LEN)

    src = jax.random.randint(skey, (B, S), 1, INPUT_DIM, dtype=jnp.int32)
    src = src.at[1, -2:].set(PAD_IDX)                                 # some padding
    src_mask = (src != PAD_IDX)[:, None, None, :].astype(jnp.int32)   # (B,1,1,S)

    out = encoder_forward(params, src, src_mask, N_HEADS)
    out = jax.block_until_ready(out)
    assert out.shape == (B, S, HID_DIM) and out.dtype == jnp.float32

    # Kernel uses bf16 MXU operands (f32 accumulation) and an approx EUP
    # reciprocal in the softmax; compare vs f32 reference with loosened tolerance.
    ref = _ref_encoder(params, src, src_mask, N_HEADS)
    assert jnp.allclose(out, ref, atol=5e-2, rtol=5e-2), "mismatch vs JAX reference"

    print("KERNEL_OK")
</pallas_src>

<mosaic_0001>
module attributes {stable_mosaic.version = 11 : i64} {
  func.func @_probe(%arg0: i32, %arg1: memref<8x128xf32, #tpu.memory_space<vmem>>, %arg2: memref<8x128xf32, #tpu.memory_space<vmem>>, %arg3: memref<8x128xf32, #tpu.memory_space<vmem>>) attributes {dimension_semantics = [#tpu.dimension_semantics<arbitrary>], iteration_bounds = array<i64: 2>, scalar_prefetch = 0 : i64, scratch_operands = 0 : i64, tpu.core_type = #tpu.core_type<tc>, window_params = [{pipeline_mode = #tpu.pipeline_mode<synchronous>, transform_indices = @transform_0, window_bounds = array<i64: 8, 128>}, {transform_indices = @transform_1, window_bounds = array<i64: 8, 128>}, {transform_indices = @transform_2, window_bounds = array<i64: 8, 128>}]} {
    %c0 = arith.constant 0 : index
    %c0_0 = arith.constant 0 : index
    %0 = vector.load %arg2[%c0, %c0_0] : memref<8x128xf32, #tpu.memory_space<vmem>>, vector<8x128xf32>
    %c0_1 = arith.constant 0 : index
    %c0_2 = arith.constant 0 : index
    %1 = vector.load %arg1[%c0_1, %c0_2] : memref<8x128xf32, #tpu.memory_space<vmem>>, vector<8x128xf32>
    %2 = arith.addf %0, %1 : vector<8x128xf32>
    %c0_3 = arith.constant 0 : index
    %c0_4 = arith.constant 0 : index
    %3 = vector.load %arg3[%c0_3, %c0_4] : memref<8x128xf32, #tpu.memory_space<vmem>>, vector<8x128xf32>
    tpu.vector_store %arg3[%c0_3, %c0_4], %2 {strides = array<i32>} : memref<8x128xf32, #tpu.memory_space<vmem>>, vector<8x128xf32>,
    return
  }
  func.func @transform_0(%arg0: i32) -> (i32, i32) {
    %c0_i32 = arith.constant 0 : i32
    %c0_i32_0 = arith.constant 0 : i32
    %c0_i32_1 = arith.constant 0 : i32
    return %c0_i32, %c0_i32_0 : i32, i32
  }
  func.func @transform_1(%arg0: i32) -> (i32, i32) {
    %c0_i32 = arith.constant 0 : i32
    %c0_i32_0 = arith.constant 0 : i32
    return %arg0, %c0_i32 : i32, i32
  }
  func.func @transform_2(%arg0: i32) -> (i32, i32) {
    %c0_i32 = arith.constant 0 : i32
    %c0_i32_0 = arith.constant 0 : i32
    return %arg0, %c0_i32 : i32, i32
  }
}

module attributes {stable_mosaic.version = 11 : i64} {
  func.func @_kv_proj_kernel(%arg0: i32, %arg1: i32, %arg2: memref<1x8x32xf32, #tpu.memory_space<vmem>>, %arg3: memref<4x32x8xbf16, #tpu.memory_space<vmem>>, %arg4: memref<4x1x8xf32, #tpu.memory_space<vmem>>, %arg5: memref<4x32x8xbf16, #tpu.memory_space<vmem>>, %arg6: memref<4x1x8xf32, #tpu.memory_space<vmem>>, %arg7: memref<1x4x8x8xbf16, #tpu.memory_space<vmem>>, %arg8: memref<1x4x8x8xbf16, #tpu.memory_space<vmem>>) attributes {dimension_semantics = [#tpu.dimension_semantics<parallel>, #tpu.dimension_semantics<parallel>], iteration_bounds = array<i64: 2, 1>, scalar_prefetch = 0 : i64, scratch_operands = 0 : i64, tpu.core_type = #tpu.core_type<tc>, window_params = [{transform_indices = @transform_0, window_bounds = array<i64: 1, 8, 32>}, {pipeline_mode = #tpu.pipeline_mode<synchronous>, transform_indices = @transform_1, window_bounds = array<i64: 4, 32, 8>}, {pipeline_mode = #tpu.pipeline_mode<synchronous>, transform_indices = @transform_2, window_bounds = array<i64: 4, 1, 8>}, {pipeline_mode = #tpu.pipeline_mode<synchronous>, transform_indices = @transform_3, window_bounds = array<i64: 4, 32, 8>}, {pipeline_mode = #tpu.pipeline_mode<synchronous>, transform_indices = @transform_4, window_bounds = array<i64: 4, 1, 8>}, {transform_indices = @transform_5, window_bounds = array<i64: 1, 4, 8, 8>}, {transform_indices = @transform_6, window_bounds = array<i64: 1, 4, 8, 8>}]} {
    %c0 = arith.constant 0 : index
    %c0_0 = arith.constant 0 : index
    %c0_1 = arith.constant 0 : index
    %0 = vector.load %arg2[%c0, %c0_0, %c0_1] : memref<1x8x32xf32, #tpu.memory_space<vmem>>, vector<1x8x32xf32>
    %1 = vector.shape_cast %0 : vector<1x8x32xf32> to vector<8x32xf32>
    %2 = arith.truncf %1 : vector<8x32xf32> to vector<8x32xbf16>
    %c0_2 = arith.constant 0 : index
    %c0_3 = arith.constant 0 : index
    %c0_4 = arith.constant 0 : index
    %3 = vector.load %arg3[%c0_2, %c0_3, %c0_4] : memref<4x32x8xbf16, #tpu.memory_space<vmem>>, vector<1x32x8xbf16>
    %4 = vector.shape_cast %3 : vector<1x32x8xbf16> to vector<32x8xbf16>
    %cst = arith.constant dense<0.000000e+00> : vector<8x8xf32>
    %5 = tpu.matmul %2, %4, %cst {dimension_numbers = #tpu.dot_dimension_numbers<[1], [0], [0], [1], [0, 0, 1, 1], [], []>} : vector<8x32xbf16>, vector<32x8xbf16>, vector<8x8xf32> -> vector<8x8xf32>
    %c0_5 = arith.constant 0 : index
    %c0_6 = arith.constant 0 : index
    %c0_7 = arith.constant 0 : index
    %6 = vector.load %arg4[%c0_5, %c0_6, %c0_7] : memref<4x1x8xf32, #tpu.memory_space<vmem>>, vector<1x1x8xf32>
    %7 = vector.shape_cast %6 : vector<1x1x8xf32> to vector<1x8xf32>
    %8 = vector.broadcast %7 : vector<1x8xf32> to vector<8x8xf32>
    %9 = arith.addf %5, %8 : vector<8x8xf32>
    %c0_8 = arith.constant 0 : index
    %c0_9 = arith.constant 0 : index
    %c0_10 = arith.constant 0 : index
    %10 = vector.load %arg5[%c0_8, %c0_9, %c0_10] : memref<4x32x8xbf16, #tpu.memory_space<vmem>>, vector<1x32x8xbf16>
    %11 = vector.shape_cast %10 : vector<1x32x8xbf16> to vector<32x8xbf16>
    %cst_11 = arith.constant dense<0.000000e+00> : vector<8x8xf32>
    %12 = tpu.matmul %2, %11, %cst_11 {dimension_numbers = #tpu.dot_dimension_numbers<[1], [0], [0], [1], [0, 0, 1, 1], [], []>} : vector<8x32xbf16>, vector<32x8xbf16>, vector<8x8xf32> -> vector<8x8xf32>
    %c0_12 = arith.constant 0 : index
    %c0_13 = arith.constant 0 : index
    %c0_14 = arith.constant 0 : index
    %13 = vector.load %arg6[%c0_12, %c0_13, %c0_14] : memref<4x1x8xf32, #tpu.memory_space<vmem>>, vector<1x1x8xf32>
    %14 = vector.shape_cast %13 : vector<1x1x8xf32> to vector<1x8xf32>
    %15 = vector.broadcast %14 : vector<1x8xf32> to vector<8x8xf32>
    %16 = arith.addf %12, %15 : vector<8x8xf32>
    %17 = arith.truncf %9 : vector<8x8xf32> to vector<8x8xbf16>
    %c0_15 = arith.constant 0 : index
    %c0_16 = arith.constant 0 : index
    %c0_17 = arith.constant 0 : index
    %c0_18 = arith.constant 0 : index
    %18 = vector.load %arg7[%c0_15, %c0_16, %c0_17, %c0_18] : memref<1x4x8x8xbf16, #tpu.memory_space<vmem>>, vector<1x1x8x8xbf16>
    %19 = vector.shape_cast %18 : vector<1x1x8x8xbf16> to vector<8x8xbf16>
    %20 = vector.shape_cast %17 : vector<8x8xbf16> to vector<1x1x8x8xbf16>
    tpu.vector_store %arg7[%c0_15, %c0_16, %c0_17, %c0_18], %20 {strides = array<i32>} : memref<1x4x8x8xbf16, #tpu.memory_space<vmem>>, vector<1x1x8x8xbf16>,
    %21 = arith.truncf %16 : vector<8x8xf32> to vector<8x8xbf16>
    %c0_19 = arith.constant 0 : index
    %c0_20 = arith.constant 0 : index
    %c0_21 = arith.constant 0 : index
    %c0_22 = arith.constant 0 : index
    %22 = vector.load %arg8[%c0_19, %c0_20, %c0_21, %c0_22] : memref<1x4x8x8xbf16, #tpu.memory_space<vmem>>, vector<1x1x8x8xbf16>
    %23 = vector.shape_cast %22 : vector<1x1x8x8xbf16> to vector<8x8xbf16>
    %24 = vector.shape_cast %21 : vector<8x8xbf16> to vector<1x1x8x8xbf16>
    tpu.vector_store %arg8[%c0_19, %c0_20, %c0_21, %c0_22], %24 {strides = array<i32>} : memref<1x4x8x8xbf16, #tpu.memory_space<vmem>>, vector<1x1x8x8xbf16>,
    %c1 = arith.constant 1 : index
    %c0_23 = arith.constant 0 : index
    %c0_24 = arith.constant 0 : index
    %25 = vector.load %arg3[%c1, %c0_23, %c0_24] : memref<4x32x8xbf16, #tpu.memory_space<vmem>>, vector<1x32x8xbf16>
    %26 = vector.shape_cast %25 : vector<1x32x8xbf16> to vector<32x8xbf16>
    %cst_25 = arith.constant dense<0.000000e+00> : vector<8x8xf32>
    %27 = tpu.matmul %2, %26, %cst_25 {dimension_numbers = #tpu.dot_dimension_numbers<[1], [0], [0], [1], [0, 0, 1, 1], [], []>} : vector<8x32xbf16>, vector<32x8xbf16>, vector<8x8xf32> -> vector<8x8xf32>
    %c1_26 = arith.constant 1 : index
    %c0_27 = arith.constant 0 : index
    %c0_28 = arith.constant 0 : index
    %28 = vector.load %arg4[%c1_26, %c0_27, %c0_28] : memref<4x1x8xf32, #tpu.memory_space<vmem>>, vector<1x1x8xf32>
    %29 = vector.shape_cast %28 : vector<1x1x8xf32> to vector<1x8xf32>
    %30 = vector.broadcast %29 : vector<1x8xf32> to vector<8x8xf32>
    %31 = arith.addf %27, %30 : vector<8x8xf32>
    %c1_29 = arith.constant 1 : index
    %c0_30 = arith.constant 0 : index
    %c0_31 = arith.constant 0 : index
    %32 = vector.load %arg5[%c1_29, %c0_30, %c0_31] : memref<4x32x8xbf16, #tpu.memory_space<vmem>>, vector<1x32x8xbf16>
    %33 = vector.shape_cast %32 : vector<1x32x8xbf16> to vector<32x8xbf16>
    %cst_32 = arith.constant dense<0.000000e+00> : vector<8x8xf32>
    %34 = tpu.matmul %2, %33, %cst_32 {dimension_numbers = #tpu.dot_dimension_numbers<[1], [0], [0], [1], [0, 0, 1, 1], [], []>} : vector<8x32xbf16>, vector<32x8xbf16>, vector<8x8xf32> -> vector<8x8xf32>
    %c1_33 = arith.constant 1 : index
    %c0_34 = arith.constant 0 : index
    %c0_35 = arith.constant 0 : index
    %35 = vector.load %arg6[%c1_33, %c0_34, %c0_35] : memref<4x1x8xf32, #tpu.memory_space<vmem>>, vector<1x1x8xf32>
    %36 = vector.shape_cast %35 : vector<1x1x8xf32> to vector<1x8xf32>
    %37 = vector.broadcast %36 : vector<1x8xf32> to vector<8x8xf32>
    %38 = arith.addf %34, %37 : vector<8x8xf32>
    %39 = arith.truncf %31 : vector<8x8xf32> to vector<8x8xbf16>
    %c0_36 = arith.constant 0 : index
    %c1_37 = arith.constant 1 : index
    %c0_38 = arith.constant 0 : index
    %c0_39 = arith.constant 0 : index
    %40 = vector.load %arg7[%c0_36, %c1_37, %c0_38, %c0_39] : memref<1x4x8x8xbf16, #tpu.memory_space<vmem>>, vector<1x1x8x8xbf16>
    %41 = vector.shape_cast %40 : vector<1x1x8x8xbf16> to vector<8x8xbf16>
    %42 = vector.shape_cast %39 : vector<8x8xbf16> to vector<1x1x8x8xbf16>
    tpu.vector_store %arg7[%c0_36, %c1_37, %c0_38, %c0_39], %42 {strides = array<i32>} : memref<1x4x8x8xbf16, #tpu.memory_space<vmem>>, vector<1x1x8x8xbf16>,
    %43 = arith.truncf %38 : vector<8x8xf32> to vector<8x8xbf16>
    %c0_40 = arith.constant 0 : index
    %c1_41 = arith.constant 1 : index
    %c0_42 = arith.constant 0 : index
    %c0_43 = arith.constant 0 : index
    %44 = vector.load %arg8[%c0_40, %c1_41, %c0_42, %c0_43] : memref<1x4x8x8xbf16, #tpu.memory_space<vmem>>, vector<1x1x8x8xbf16>
    %45 = vector.shape_cast %44 : vector<1x1x8x8xbf16> to vector<8x8xbf16>
    %46 = vector.shape_cast %43 : vector<8x8xbf16> to vector<1x1x8x8xbf16>
    tpu.vector_store %arg8[%c0_40, %c1_41, %c0_42, %c0_43], %46 {strides = array<i32>} : memref<1x4x8x8xbf16, #tpu.memory_space<vmem>>, vector<1x1x8x8xbf16>,
    %c2 = arith.constant 2 : index
    %c0_44 = arith.constant 0 : index
    %c0_45 = arith.constant 0 : index
    %47 = vector.load %arg3[%c2, %c0_44, %c0_45] : memref<4x32x8xbf16, #tpu.memory_space<vmem>>, vector<1x32x8xbf16>
    %48 = vector.shape_cast %47 : vector<1x32x8xbf16> to vector<32x8xbf16>
    %cst_46 = arith.constant dense<0.000000e+00> : vector<8x8xf32>
    %49 = tpu.matmul %2, %48, %cst_46 {dimension_numbers = #tpu.dot_dimension_numbers<[1], [0], [0], [1], [0, 0, 1, 1], [], []>} : vector<8x32xbf16>, vector<32x8xbf16>, vector<8x8xf32> -> vector<8x8xf32>
    %c2_47 = arith.constant 2 : index
    %c0_48 = arith.constant 0 : index
    %c0_49 = arith.constant 0 : index
    %50 = vector.load %arg4[%c2_47, %c0_48, %c0_49] : memref<4x1x8xf32, #tpu.memory_space<vmem>>, vector<1x1x8xf32>
    %51 = vector.shape_cast %50 : vector<1x1x8xf32> to vector<1x8xf32>
    %52 = vector.broadcast %51 : vector<1x8xf32> to vector<8x8xf32>
    %53 = arith.addf %49, %52 : vector<8x8xf32>
    %c2_50 = arith.constant 2 : index
    %c0_51 = arith.constant 0 : index
    %c0_52 = arith.constant 0 : index
    %54 = vector.load %arg5[%c2_50, %c0_51, %c0_52] : memref<4x32x8xbf16, #tpu.memory_space<vmem>>, vector<1x32x8xbf16>
    %55 = vector.shape_cast %54 : vector<1x32x8xbf16> to vector<32x8xbf16>
    %cst_53 = arith.constant dense<0.000000e+00> : vector<8x8xf32>
    %56 = tpu.matmul %2, %55, %cst_53 {dimension_numbers = #tpu.dot_dimension_numbers<[1], [0], [0], [1], [0, 0, 1, 1], [], []>} : vector<8x32xbf16>, vector<32x8xbf16>, vector<8x8xf32> -> vector<8x8xf32>
    %c2_54 = arith.constant 2 : index
    %c0_55 = arith.constant 0 : index
    %c0_56 = arith.constant 0 : index
    %57 = vector.load %arg6[%c2_54, %c0_55, %c0_56] : memref<4x1x8xf32, #tpu.memory_space<vmem>>, vector<1x1x8xf32>
    %58 = vector.shape_cast %57 : vector<1x1x8xf32> to vector<1x8xf32>
    %59 = vector.broadcast %58 : vector<1x8xf32> to vector<8x8xf32>
    %60 = arith.addf %56, %59 : vector<8x8xf32>
    %61 = arith.truncf %53 : vector<8x8xf32> to vector<8x8xbf16>
    %c0_57 = arith.constant 0 : index
    %c2_58 = arith.constant 2 : index
    %c0_59 = arith.constant 0 : index
    %c0_60 = arith.constant 0 : index
    %62 = vector.load %arg7[%c0_57, %c2_58, %c0_59, %c0_60] : memref<1x4x8x8xbf16, #tpu.memory_space<vmem>>, vector<1x1x8x8xbf16>
    %63 = vector.shape_cast %62 : vector<1x1x8x8xbf16> to vector<8x8xbf16>
    %64 = vector.shape_cast %61 : vector<8x8xbf16> to vector<1x1x8x8xbf16>
    tpu.vector_store %arg7[%c0_57, %c2_58, %c0_59, %c0_60], %64 {strides = array<i32>} : memref<1x4x8x8xbf16, #tpu.memory_space<vmem>>, vector<1x1x8x8xbf16>,
    %65 = arith.truncf %60 : vector<8x8xf32> to vector<8x8xbf16>
    %c0_61 = arith.constant 0 : index
    %c2_62 = arith.constant 2 : index
    %c0_63 = arith.constant 0 : index
    %c0_64 = arith.constant 0 : index
    %66 = vector.load %arg8[%c0_61, %c2_62, %c0_63, %c0_64] : memref<1x4x8x8xbf16, #tpu.memory_space<vmem>>, vector<1x1x8x8xbf16>
    %67 = vector.shape_cast %66 : vector<1x1x8x8xbf16> to vector<8x8xbf16>
    %68 = vector.shape_cast %65 : vector<8x8xbf16> to vector<1x1x8x8xbf16>
    tpu.vector_store %arg8[%c0_61, %c2_62, %c0_63, %c0_64], %68 {strides = array<i32>} : memref<1x4x8x8xbf16, #tpu.memory_space<vmem>>, vector<1x1x8x8xbf16>,
    %c3 = arith.constant 3 : index
    %c0_65 = arith.constant 0 : index
    %c0_66 = arith.constant 0 : index
    %69 = vector.load %arg3[%c3, %c0_65, %c0_66] : memref<4x32x8xbf16, #tpu.memory_space<vmem>>, vector<1x32x8xbf16>
    %70 = vector.shape_cast %69 : vector<1x32x8xbf16> to vector<32x8xbf16>
    %cst_67 = arith.constant dense<0.000000e+00> : vector<8x8xf32>
    %71 = tpu.matmul %2, %70, %cst_67 {dimension_numbers = #tpu.dot_dimension_numbers<[1], [0], [0], [1], [0, 0, 1, 1], [], []>} : vector<8x32xbf16>, vector<32x8xbf16>, vector<8x8xf32> -> vector<8x8xf32>
    %c3_68 = arith.constant 3 : index
    %c0_69 = arith.constant 0 : index
    %c0_70 = arith.constant 0 : index
    %72 = vector.load %arg4[%c3_68, %c0_69, %c0_70] : memref<4x1x8xf32, #tpu.memory_space<vmem>>, vector<1x1x8xf32>
    %73 = vector.shape_cast %72 : vector<1x1x8xf32> to vector<1x8xf32>
    %74 = vector.broadcast %73 : vector<1x8xf32> to vector<8x8xf32>
    %75 = arith.addf %71, %74 : vector<8x8xf32>
    %c3_71 = arith.constant 3 : index
    %c0_72 = arith.constant 0 : index
    %c0_73 = arith.constant 0 : index
    %76 = vector.load %arg5[%c3_71, %c0_72, %c0_73] : memref<4x32x8xbf16, #tpu.memory_space<vmem>>, vector<1x32x8xbf16>
    %77 = vector.shape_cast %76 : vector<1x32x8xbf16> to vector<32x8xbf16>
    %cst_74 = arith.constant dense<0.000000e+00> : vector<8x8xf32>
    %78 = tpu.matmul %2, %77, %cst_74 {dimension_numbers = #tpu.dot_dimension_numbers<[1], [0], [0], [1], [0, 0, 1, 1], [], []>} : vector<8x32xbf16>, vector<32x8xbf16>, vector<8x8xf32> -> vector<8x8xf32>
    %c3_75 = arith.constant 3 : index
    %c0_76 = arith.constant 0 : index
    %c0_77 = arith.constant 0 : index
    %79 = vector.load %arg6[%c3_75, %c0_76, %c0_77] : memref<4x1x8xf32, #tpu.memory_space<vmem>>, vector<1x1x8xf32>
    %80 = vector.shape_cast %79 : vector<1x1x8xf32> to vector<1x8xf32>
    %81 = vector.broadcast %80 : vector<1x8xf32> to vector<8x8xf32>
    %82 = arith.addf %78, %81 : vector<8x8xf32>
    %83 = arith.truncf %75 : vector<8x8xf32> to vector<8x8xbf16>
    %c0_78 = arith.constant 0 : index
    %c3_79 = arith.constant 3 : index
    %c0_80 = arith.constant 0 : index
    %c0_81 = arith.constant 0 : index
    %84 = vector.load %arg7[%c0_78, %c3_79, %c0_80, %c0_81] : memref<1x4x8x8xbf16, #tpu.memory_space<vmem>>, vector<1x1x8x8xbf16>
    %85 = vector.shape_cast %84 : vector<1x1x8x8xbf16> to vector<8x8xbf16>
    %86 = vector.shape_cast %83 : vector<8x8xbf16> to vector<1x1x8x8xbf16>
    tpu.vector_store %arg7[%c0_78, %c3_79, %c0_80, %c0_81], %86 {strides = array<i32>} : memref<1x4x8x8xbf16, #tpu.memory_space<vmem>>, vector<1x1x8x8xbf16>,
    %87 = arith.truncf %82 : vector<8x8xf32> to vector<8x8xbf16>
    %c0_82 = arith.constant 0 : index
    %c3_83 = arith.constant 3 : index
    %c0_84 = arith.constant 0 : index
    %c0_85 = arith.constant 0 : index
    %88 = vector.load %arg8[%c0_82, %c3_83, %c0_84, %c0_85] : memref<1x4x8x8xbf16, #tpu.memory_space<vmem>>, vector<1x1x8x8xbf16>
    %89 = vector.shape_cast %88 : vector<1x1x8x8xbf16> to vector<8x8xbf16>
    %90 = vector.shape_cast %87 : vector<8x8xbf16> to vector<1x1x8x8xbf16>
    tpu.vector_store %arg8[%c0_82, %c3_83, %c0_84, %c0_85], %90 {strides = array<i32>} : memref<1x4x8x8xbf16, #tpu.memory_space<vmem>>, vector<1x1x8x8xbf16>,
    return
  }
  func.func @transform_0(%arg0: i32, %arg1: i32) -> (i32, i32, i32) {
    %c0_i32 = arith.constant 0 : i32
    %c0_i32_0 = arith.constant 0 : i32
    return %arg0, %arg1, %c0_i32 : i32, i32, i32
  }
  func.func @transform_1(%arg0: i32, %arg1: i32) -> (i32, i32, i32) {
    %c0_i32 = arith.constant 0 : i32
    %c0_i32_0 = arith.constant 0 : i32
    %c0_i32_1 = arith.constant 0 : i32
    %c0_i32_2 = arith.constant 0 : i32
    return %c0_i32, %c0_i32_0, %c0_i32_1 : i32, i32, i32
  }
  func.func @transform_2(%arg0: i32, %arg1: i32) -> (i32, i32, i32) {
    %c0_i32 = arith.constant 0 : i32
    %c0_i32_0 = arith.constant 0 : i32
    %c0_i32_1 = arith.constant 0 : i32
    %c0_i32_2 = arith.constant 0 : i32
    return %c0_i32, %c0_i32_0, %c0_i32_1 : i32, i32, i32
  }
  func.func @transform_3(%arg0: i32, %arg1: i32) -> (i32, i32, i32) {
    %c0_i32 = arith.constant 0 : i32
    %c0_i32_0 = arith.constant 0 : i32
    %c0_i32_1 = arith.constant 0 : i32
    %c0_i32_2 = arith.constant 0 : i32
    return %c0_i32, %c0_i32_0, %c0_i32_1 : i32, i32, i32
  }
  func.func @transform_4(%arg0: i32, %arg1: i32) -> (i32, i32, i32) {
    %c0_i32 = arith.constant 0 : i32
    %c0_i32_0 = arith.constant 0 : i32
    %c0_i32_1 = arith.constant 0 : i32
    %c0_i32_2 = arith.constant 0 : i32
    return %c0_i32, %c0_i32_0, %c0_i32_1 : i32, i32, i32
  }
  func.func @transform_5(%arg0: i32, %arg1: i32) -> (i32, i32, i32, i32) {
    %c0_i32 = arith.constant 0 : i32
    %c0_i32_0 = arith.constant 0 : i32
    %c0_i32_1 = arith.constant 0 : i32
    return %arg0, %c0_i32, %arg1, %c0_i32_0 : i32, i32, i32, i32
  }
  func.func @transform_6(%arg0: i32, %arg1: i32) -> (i32, i32, i32, i32) {
    %c0_i32 = arith.constant 0 : i32
    %c0_i32_0 = arith.constant 0 : i32
    %c0_i32_1 = arith.constant 0 : i32
    return %arg0, %c0_i32, %arg1, %c0_i32_0 : i32, i32, i32, i32
  }
}

</mosaic_0001>

<bundles_post_ra>
// kernel: tpu_custom_call.1
= control target key start
LH: loop header
LB: loop body
LE: loop exit
PB: predicated region body
PF: predicated region fallthrough
CT: control target
= control target key end

     0   :  { %7 = vsyncpa [#allocation3], 0  ;;  %s692_s0 = inlined_call_operand.hbm [shape: f32[8,128], index: 0, kind: input, shape index: {}]   ;;  %s693_s1 = inlined_call_operand.hbm [shape: f32[16,128], index: 1, kind: input, shape index: {}]   ;;  %s694_s2 = inlined_call_operand.hbm [shape: f32[16,128], index: 2, kind: output, shape index: {}]  }
   0x1   :  { %8 = vsyncpa [#allocation6], 0 }
   0x2   :  { %10 = vsyncpa [#allocation6 + $0x1], 0 }
   0x3   :  { %11 = vsyncpa [#allocation4], 0 }
   0x4   :  { %13 = vsyncpa [#allocation4 + $0x1], 0  ;;  %s491_s9 = smov 0   ;;  %s493_s10 = smov 0  }
   0x5   :  { %s495_s11 = smov 0   ;;  %s497_s12 = smov 0  }
   0x6 LB: > { %s512_s13 = sadd.s32 4294967295, %s471_s12   ;;  %s272_s14 = sadd.s32 4294967294, %s471_s12   ;;  %s471_s12 = sphi %s497_s12, %s718_s12   ;;  %s467_s11 = sphi %s495_s11, %s717_s11   ;;  %s463_s10 = sphi %s493_s10, %s716_s10   ;;  %s459_s9 = sphi %s491_s9, %s715_s9  }
   0x7   : > { %p60_p0 = scmp.ne.s32.totalorder %s463_s10, %s459_s9  ;;  %p695_p1 = scmp.eq.s32.totalorder %s512_s13, 0 }
   0x8   : > { %p90_p3 = scmp.eq.s32.totalorder %s272_s14, 1  ;;  %p273_p5 = scmp.ge.s32.totalorder %s471_s12, 1 }
   0x9   : > { %p521_p4 = por %p695_p1, %p60_p0  ;;  %p97_p7 = scmp.lt.s32.totalorder %s471_s12, 3 }
   0xa   : > { %p526_p6 = por %p90_p3, %p60_p0  ;;  %s473_s18 = smov [#allocation2]  }
   0xb   : > { %s698_s15 = scalar_select %p521_p4, 1, 0 }
   0xc   : > { %s699_s16 = scalar_select %p526_p6, 1, 0 }
   0xd   : > { %p531_p8 = pnand %p273_p5, %p97_p7  ;;  %s110_s19 = sshll.u32 %s473_s18, 4  ;;  %s111_s19 = int_to_ptr.vmem [resolvable:$true] %s110_s19 }
   0xe   : > { %s539_s20 = sadd.s32 1, %s471_s12   ;;  %s47_s24 = sadd.s32 1, %s467_s11 }
   0xf   : > { %s700_s17 = scalar_select %p531_p8, 1, 0 }
  0x10   : > { %p294_p10 = pneg %p531_p8  ;;  %s44_s22 = ssub.s32 %s471_s12, %s539_s20 }
  0x11   : > { %p549_p12 = scmp.eq.s32.totalorder %s44_s22, 0  ;;  %s343_s27 = scalar_lea.hbm %s692_s0, 128 }
  0x12   : > { %p543_p11 = pnand %p294_p10, %p695_p1  ;;  %p344_p0 = scmp.ne.s32.totalorder %s692_s0, %s343_s27 }
  0x13   : > { %s702_s23 = scalar_select %p549_p12, 1, 0 }
  0x14   : > { %p345_p3 = pneg %p543_p11  ;;  %p350_p10 = scmp.lt.u32.totalorder %s343_s27, %s692_s0 }
  0x16   : > { %p346_p5 = pnand %p345_p3, %p344_p0 }
  0x18   : > { %p347_p7 = pneg %p346_p5 }
  0x1a   : > { %p352_p9 = pnand %p350_p10, %p347_p7 }
  0x1c   : > { %355 = shalt.err (!%p352_p9)
}
  0x1d   : > { %s356_s4 = scalar_lea.vmem %s111_s19, 128  ;;  %p364_p6 = scmp.lt.s32.totalorder %s111_s19, %s111_s19 }
  0x1e   : > { %p357_p1 = scmp.ne.s32.totalorder %s111_s19, %s356_s4  ;;  %p365_p4 = scmp.lt.s32.totalorder %s356_s4, %s356_s4 }
  0x20   : > { %p359_p2 = pnand %p357_p1, %p345_p3  ;;  %p366_p8 = por %p365_p4, %p364_p6 }
  0x22   : > { %p360_p13 = pneg %p359_p2 }
  0x24   : > { %p367_p12 = pnand %p366_p8, %p360_p13 }
  0x26   : > { %370 = shalt.err (!%p367_p12)
}
  0x27   : > { %297 = dma.hbm_to_vmem [thread:$0]  (!%p543_p11), %s692_s0, 128, %s111_s19, [#allocation3]  }
  0x28   : > { %p703_p1 = scmp.ne.s32.totalorder %s702_s23, 0  ;;  %p55_p2 = scmp.eq.s32.totalorder %s471_s12, 0 }
  0x29   : > { %p704_p4 = scmp.ne.s32.totalorder %s467_s11, %s463_s10  ;;  %p705_p6 = scmp.eq.s32.totalorder %s512_s13, 1 }
  0x2a   : > { %s575_s7 = scalar_select %p703_p1, %s467_s11, %s47_s24  }
  0x2b   : > { %p583_p8 = por %p705_p6, %p704_p4  ;;  %p307_p9 = scmp.lt.s32.totalorder %s471_s12, 2 }
  0x2c   : > { %s121_s14 = sand.u32 1, %s467_s11   ;;  %p707_p12 = pmov %p704_p4 }
  0x2d   : > { %s276_s18 = sshll.u32 %s121_s14, 3  ;;  %s277_s21 = sshll.u32 %s471_s12, 7 }
  0x2e   : > { %p56_p13 = por %p55_p2, %p707_p12  ;;  %s596_s19 = scalar_lea.hbm %s693_s1, %s277_s21 }
  0x2f   : > { %s125_s23 = scalar_lea.vmem [#allocation5], %s276_s18  ;;  %s122_s27 = scalar_lea.sflag [#allocation6], %s121_s14 }
  0x30   : > { %s132_s24 = sshll.u32 %s125_s23, 4  ;;  %p598_p11 = pnand %p307_p9, %p56_p13  ;;  %s602_s24 = int_to_ptr.vmem [resolvable:$true] %s132_s24 }
  0x31   : > { %s371_s28 = scalar_lea.hbm %s596_s19, 128  ;;  %s376_s3 = scalar_lea.hbm %s693_s1, 256 }
  0x32   : > { %p372_p0 = scmp.ne.s32.totalorder %s596_s19, %s371_s28  ;;  %p373_p3 = pneg %p598_p11 }
  0x33   : > { %p377_p10 = scmp.lt.u32.totalorder %s596_s19, %s693_s1  ;;  %p378_p1 = scmp.lt.u32.totalorder %s376_s3, %s371_s28 }
  0x34   : > { %p374_p5 = pnand %p373_p3, %p372_p0  ;;  %p380_p4 = scmp.lt.u32.totalorder %s371_s28, %s596_s19 }
  0x35   : > { %p379_p2 = por %p378_p1, %p377_p10 }
  0x36   : > { %p375_p7 = pneg %p374_p5 }
  0x37   : > { %p381_p6 = por %p380_p4, %p379_p2 }
  0x39   : > { %p382_p9 = pnand %p381_p6, %p375_p7 }
  0x3b   : > { %385 = shalt.err (!%p382_p9)
}
  0x3c   : > { %s386_s6 = scalar_lea.vmem %s602_s24, 128  ;;  %s474_s14 = smov [#allocation5]  }
  0x3d   : > { %p387_p12 = scmp.ne.s32.totalorder %s602_s24, %s386_s6  ;;  %s391_s18 = sshll.u32 %s474_s14, 4  ;;  %s392_s18 = int_to_ptr.vmem [resolvable:$false] %s391_s18 }
  0x3e   : > { %s393_s21 = scalar_lea.vmem %s392_s18, 256  ;;  %p394_p5 = scmp.lt.s32.totalorder %s602_s24, %s392_s18 }
  0x3f   : > { %p389_p13 = pnand %p387_p12, %p373_p3  ;;  %p395_p10 = scmp.lt.s32.totalorder %s393_s21, %s386_s6 }
  0x41   : > { %p390_p0 = pneg %p389_p13  ;;  %p396_p1 = por %p395_p10, %p394_p5 }
  0x43   : > { %p397_p2 = pnand %p396_p1, %p390_p0 }
  0x45   : > { %400 = shalt.err (!%p397_p2)
}
  0x46   : > { %301 = dma.hbm_to_vmem [thread:$0]  (!%p598_p11), %s596_s19, 128, %s602_s24, %s122_s27  }
  0x47   : > { %p709_p7 = scmp.ne.s32.totalorder %s700_s17, 0 }
  0x48   : > { %p710_p3 = scmp.eq.s32.totalorder (!%p709_p7), %s512_s13, 0 }
  0x49   : > { %141 = sbr.rel (%p709_p7) target bundleno = 110 (0x6e), region = 28 }
  0x50   : > { %446 = dma.done.wait (%p710_p3), [#allocation3], 128   ;;  %p711_p4 = pmov %p710_p3 }
  0x51   : > { %s636_s22 = sand.u32 1, %s463_s10   ;;  %p712_p6 = scmp.ne.s32.totalorder %s698_s15, 0 }
  0x52   : > { %448 = vsyncadd (%p711_p4), [#allocation3], 4294967168  ;;  %s280_s25 = sshll.u32 %s636_s22, 3  ;;  %s148_s23 = scalar_lea.sflag [#allocation6], %s636_s22 }
  0x53   : > { %s151_s26 = scalar_lea.vmem [#allocation5], %s280_s25 }
  0x54   : > { %450 = dma.done.wait (%p712_p6), %s148_s23, 128  }
  0x55   : > { %452 = vsyncadd (%p712_p6), %s148_s23, 4294967168  ;;  %s171_s17 = scalar_lea.vmem [#allocation7], %s280_s25  ;;  %s283_s24 = sshll.u32 %s512_s13, 7  ;;  %v172_v0 = vld [vmem:[%s151_s26] sm:$0xff]  ;;  %v173_v1 = vld [vmem:[#allocation2] sm:$0xff] }
  0x56   : > { %s190_s19 = sshll.u32 %s171_s17, 4  ;;  %v174_v2 = vadd.f32 %v173_v1, %v172_v0  ;;  %s650_s29 = scalar_lea.hbm %s694_s2, %s283_s24  ;;  %s645_s19 = int_to_ptr.vmem [resolvable:$true] %s190_s19 }
  0x57   : > { %s177_s15 = scalar_lea.sflag [#allocation4], %s636_s22  ;;  %s401_s30 = scalar_lea.vmem %s645_s19, 128 }
  0x58   : > { %175 = vst [vmem:[%s171_s17] sm:$0xff] %v174_v2  ;;  %p402_p11 = scmp.ne.s32.totalorder %s645_s19, %s401_s30  ;;  %s475_s13 = smov [#allocation7]  }
  0x59   : > { %s405_s3 = sshll.u32 %s475_s13, 4  ;;  %s406_s3 = int_to_ptr.vmem [resolvable:$false] %s405_s3 }
  0x5a   : > { %p403_p9 = pnand %p402_p11, %p583_p8  ;;  %s407_s4 = scalar_lea.vmem %s406_s3, 256 }
  0x5b   : > { %p408_p13 = scmp.lt.s32.totalorder %s645_s19, %s406_s3  ;;  %p409_p0 = scmp.lt.s32.totalorder %s407_s4, %s401_s30 }
  0x5c   : > { %p404_p12 = pneg %p403_p9 }
  0x5d   : > { %p410_p5 = por %p409_p0, %p408_p13 }
  0x5f   : > { %p411_p10 = pnand %p410_p5, %p404_p12 }
  0x61   : > { %414 = shalt.err (!%p411_p10)
}
  0x62   : > { %s415_s5 = scalar_lea.hbm %s650_s29, 128  ;;  %s419_s18 = scalar_lea.hbm %s694_s2, 256 }
  0x63   : > { %p416_p1 = scmp.ne.s32.totalorder %s650_s29, %s415_s5  ;;  %p420_p3 = scmp.lt.u32.totalorder %s650_s29, %s694_s2 }
  0x64   : > { %p421_p4 = scmp.lt.u32.totalorder %s419_s18, %s415_s5  ;;  %p423_p11 = scmp.lt.u32.totalorder %s415_s5, %s650_s29 }
  0x65   : > { %p417_p2 = pnand %p416_p1, %p583_p8 }
  0x66   : > { %p422_p6 = por %p421_p4, %p420_p3 }
  0x67   : > { %p418_p7 = pneg %p417_p2 }
  0x68   : > { %p424_p9 = por %p423_p11, %p422_p6 }
  0x6a   : > { %p425_p12 = pnand %p424_p9, %p418_p7 }
  0x6c   : > { %428 = shalt.err (!%p425_p12)
}
  0x6d   : > { %292 = dma.vmem_to_hbm [thread:$0]  (%p583_p8), %s645_s19, 128, %s650_s29, %s177_s15  }
  0x6e PF: > { %s202_s25 = sand.u32 1, %s459_s9   ;;  %p713_p13 = scmp.ne.s32.totalorder %s699_s16, 0 }
  0x6f   : > { %p714_p0 = scmp.ge.s32.totalorder %s471_s12, 2  ;;  %s203_s23 = scalar_lea.sflag [#allocation4], %s202_s25 }
  0x71   : > { %p303_p5 = pnand %p714_p0, %p713_p13 }
  0x73   : > { %454 = dma.done.wait (!%p303_p5), %s203_s23, 128  }
  0x74   : > { %456 = vsyncadd (!%p303_p5), %s203_s23, 4294967168  ;;  %p16_p10 = scmp.ge.s32.totalorder %s539_s20, 4   ;;  %s715_s9 = smov %s463_s10 }
  0x75   : > { %s716_s10 = smov %s467_s11  ;;  %s717_s11 = smov %s575_s7 }
  0x76   : > { %s718_s12 = smov %s539_s20  ;;  %18 = sbr.rel (!%p16_p10) target bundleno = 6 (0x6), region = 78 }
  0x7d   :  { %208 = vsyncpa [#allocation3], 1 }
  0x7e   :  { %210 = vsyncpa [#allocation3 + $0x1], 1 }
  0x7f   :  { %211 = vsyncpa [#allocation6], 1 }
  0x80   :  { %213 = vsyncpa [#allocation6 + $0x1], 1 }
  0x81   :  { %214 = vsyncpa [#allocation4], 1 }
  0x82   :  { %216 = vsyncpa [#allocation4 + $0x1], 1 }

// kernel: tpu_custom_call.1
= control target key start
LH: loop header
LB: loop body
LE: loop exit
PB: predicated region body
PF: predicated region fallthrough
CT: control target
= control target key end

     0   :  { %s2093_s0 = inlined_call_operand.hbm [shape: f32[2,8,32], index: 0, kind: input, shape index: {}]   ;;  %s2094_s1 = inlined_call_operand.hbm [shape: bf16[4,32,8], index: 1, kind: input, shape index: {}]   ;;  %s2095_s2 = inlined_call_operand.hbm [shape: f32[4,1,8], index: 2, kind: input, shape index: {}]   ;;  %s2096_s3 = inlined_call_operand.hbm [shape: bf16[4,32,8], index: 3, kind: input, shape index: {}]   ;;  %s2097_s4 = inlined_call_operand.hbm [shape: f32[4,1,8], index: 4, kind: input, shape index: {}]   ;;  %s2098_s5 = inlined_call_operand.hbm [shape: bf16[2,4,8,8], index: 5, kind: output, shape index: {0}]   ;;  %s2099_s6 = inlined_call_operand.hbm [shape: bf16[2,4,8,8], index: 6, kind: output, shape index: {1}]  }
   0x1   :  { %2105 = sst [smem:[#allocation19_spill]] %s2094_s1 }
   0x2   :  { %12 = vsyncpa [#allocation3], 0 }
   0x3   :  { %14 = vsyncpa [#allocation3 + $0x1], 0 }
   0x4   :  { %15 = vsyncpa [#allocation6], 0 }
   0x5   :  { %16 = vsyncpa [#allocation9], 0 }
   0x6   :  { %17 = vsyncpa [#allocation4], 0 }
   0x7   :  { %19 = vsyncpa [#allocation4 + $0x1], 0 }
   0x8   :  { %20 = vsyncpa [#allocation13], 0 }
   0x9   :  { %22 = vsyncpa [#allocation13 + $0x1], 0  ;;  %s1696_s21 = smov 0   ;;  %s1698_s22 = smov 0  }
   0xa   :  { %s1700_s23 = smov 0   ;;  %s1702_s24 = smov 0  }
   0xb   :  { %s1704_s25 = smov 0   ;;  %s1706_s26 = smov 0  }
   0xc LB: > { %s2100_s27 = sadd.s32 4294967295, %s1644_s26   ;;  %p1096_p0 = scmp.ge.s32.totalorder %s1644_s26, 1  ;;  %s1644_s26 = sphi %s1706_s26, %s28_s26   ;;  %s1640_s25 = sphi %s1704_s25, %s2127_s25   ;;  %s1636_s24 = sphi %s1702_s24, %s2126_s24   ;;  %s1632_s23 = sphi %s1700_s23, %s2125_s23   ;;  %s1628_s22 = sphi %s1698_s22, %s2124_s22   ;;  %s1624_s21 = sphi %s1696_s21, %s2123_s21  }
   0xd   : > { %p1730_p1 = scmp.eq.s32.totalorder %s2100_s27, 0  ;;  %p213_p2 = scmp.lt.s32.totalorder %s1644_s26, 3 }
   0xe   : > { %s1646_s30 = smov [#allocation5]   ;;  %s1647_s9 = smov [#allocation8]  }
   0xf   : > { %s2106_s28 = scalar_select %p1730_p1, 1, 0 }
  0x10   : > { %p1735_p3 = pnand %p1096_p0, %p213_p2  ;;  %s225_s7 = sshll.u32 %s1646_s30, 4  ;;  %s1739_s7 = int_to_ptr.vmem [resolvable:$true] %s225_s7 }
  0x11   : > { %s251_s10 = sshll.u32 %s1647_s9, 4  ;;  %s1648_s11 = smov [#allocation7]   ;;  %s1750_s10 = int_to_ptr.vmem [resolvable:$true] %s251_s10 }
  0x12   : > { %s2107_s29 = scalar_select %p1735_p3, 1, 0 }
  0x13   : > { %p1270_p4 = pneg %p1735_p3  ;;  %s1752_s12 = sshll.u32 %s1648_s11, 4  ;;  %s239_s12 = int_to_ptr.vmem [resolvable:$true] %s1752_s12 }
  0x14   : > { %s2109_s1 = sld [smem:[#allocation19_spill]] }
  0x15   : > { %p1746_p6 = pnand %p1270_p4, %p1730_p1 }
  0x17   : > { %p1762_p8 = pneg %p1746_p6 }
  0x1a   : > { %s1380_s15 = scalar_lea.hbm %s2109_s1, 1024 }
  0x1b   : > { %p1381_p7 = scmp.ne.s32.totalorder %s2109_s1, %s1380_s15  ;;  %p1387_p11 = scmp.lt.u32.totalorder %s1380_s15, %s2109_s1 }
  0x1d   : > { %p1383_p9 = pnand %p1762_p8, %p1381_p7 }
  0x1f   : > { %p1384_p10 = pneg %p1383_p9 }
  0x21   : > { %p1389_p12 = pnand %p1387_p11, %p1384_p10 }
  0x23   : > { %1392 = shalt.err (!%p1389_p12)
}
  0x24   : > { %s1393_s30 = scalar_lea.vmem %s1739_s7, 1024  ;;  %p1401_p4 = scmp.lt.s32.totalorder %s1739_s7, %s1739_s7 }
  0x25   : > { %p1394_p13 = scmp.ne.s32.totalorder %s1739_s7, %s1393_s30  ;;  %p1402_p5 = scmp.lt.s32.totalorder %s1393_s30, %s1393_s30 }
  0x27   : > { %p1396_p0 = pnand %p1394_p13, %p1762_p8  ;;  %p1403_p7 = por %p1402_p5, %p1401_p4 }
  0x29   : > { %p1397_p2 = pneg %p1396_p0 }
  0x2b   : > { %p1404_p9 = pnand %p1403_p7, %p1397_p2 }
  0x2d   : > { %1407 = shalt.err (!%p1404_p9)
}
  0x2e   : > { %s1649_s9 = smov 64   ;;  %s1650_s11 = smov 4  }
  0x2f   : > { %1273 = dma.hbm_to_vmem [thread:$0]  (!%p1746_p6), %s2109_s1, 1024, %s1739_s7, [#allocation6], %s1649_s9, %s1649_s9, %s1650_s11  }
  0x30   : > { %s1408_s17 = scalar_lea.hbm %s2096_s3, 1024 }
  0x31   : > { %p1409_p5 = scmp.ne.s32.totalorder %s2096_s3, %s1408_s17  ;;  %p1415_p12 = scmp.lt.u32.totalorder %s1408_s17, %s2096_s3 }
  0x33   : > { %p1411_p10 = pnand %p1409_p5, %p1762_p8 }
  0x35   : > { %p1412_p11 = pneg %p1411_p10 }
  0x37   : > { %p1417_p13 = pnand %p1415_p12, %p1412_p11 }
  0x39   : > { %1420 = shalt.err (!%p1417_p13)
}
  0x3a   : > { %s1421_s7 = scalar_lea.vmem %s1750_s10, 1024  ;;  %p1429_p7 = scmp.lt.s32.totalorder %s1750_s10, %s1750_s10 }
  0x3b   : > { %p1422_p0 = scmp.ne.s32.totalorder %s1750_s10, %s1421_s7  ;;  %p1430_p9 = scmp.lt.s32.totalorder %s1421_s7, %s1421_s7 }
  0x3d   : > { %p1424_p2 = pnand %p1422_p0, %p1762_p8  ;;  %p1431_p5 = por %p1430_p9, %p1429_p7 }
  0x3f   : > { %p1425_p4 = pneg %p1424_p2 }
  0x41   : > { %p1432_p10 = pnand %p1431_p5, %p1425_p4 }
  0x43   : > { %1435 = shalt.err (!%p1432_p10)
}
  0x44   : > { %1279 = dma.hbm_to_vmem [thread:$0]  (!%p1746_p6), %s2096_s3, 1024, %s1750_s10, [#allocation9], %s1649_s9, %s1649_s9, %s1650_s11  }
  0x45   : > { %s1436_s16 = scalar_lea.hbm %s2095_s2, 64 }
  0x46   : > { %p1437_p11 = scmp.ne.s32.totalorder %s2095_s2, %s1436_s16  ;;  %p1443_p0 = scmp.lt.u32.totalorder %s1436_s16, %s2095_s2 }
  0x48   : > { %p1439_p12 = pnand %p1437_p11, %p1762_p8 }
  0x4a   : > { %p1440_p13 = pneg %p1439_p12 }
  0x4c   : > { %p1445_p2 = pnand %p1443_p0, %p1440_p13 }
  0x4e   : > { %1448 = shalt.err (!%p1445_p2)
}
  0x4f   : > { %s1449_s7 = scalar_lea.vmem %s239_s12, 64  ;;  %p1457_p5 = scmp.lt.s32.totalorder %s239_s12, %s239_s12 }
  0x50   : > { %p1450_p4 = scmp.ne.s32.totalorder %s239_s12, %s1449_s7  ;;  %p1458_p10 = scmp.lt.s32.totalorder %s1449_s7, %s1449_s7 }
  0x52   : > { %p1452_p7 = pnand %p1450_p4, %p1762_p8  ;;  %p1459_p3 = por %p1458_p10, %p1457_p5 }
  0x54   : > { %p1453_p9 = pneg %p1452_p7 }
  0x56   : > { %p1460_p1 = pnand %p1459_p3, %p1453_p9 }
  0x58   : > { %1463 = shalt.err (!%p1460_p1)
}
  0x59   : > { %s1651_s10 = smov 16   ;;  %s1652_s9 = smov 1  }
  0x5a   : > { %1276 = dma.hbm_to_vmem [thread:$0]  (!%p1746_p6), %s2095_s2, 64, %s239_s12, [#allocation6], %s1651_s10, %s1651_s10, %s1652_s9  }
  0x5b   : > { %s1653_s13 = smov [#allocation10]   ;;  %s1464_s17 = scalar_lea.hbm %s2097_s4, 64 }
  0x5c   : > { %s264_s14 = sshll.u32 %s1653_s13, 4  ;;  %p1465_p1 = scmp.ne.s32.totalorder %s2097_s4, %s1464_s17  ;;  %s265_s14 = int_to_ptr.vmem [resolvable:$true] %s264_s14 }
  0x5d   : > { %p1471_p12 = scmp.lt.u32.totalorder %s1464_s17, %s2097_s4 }
  0x5e   : > { %p1467_p3 = pnand %p1465_p1, %p1762_p8 }
  0x60   : > { %p1468_p11 = pneg %p1467_p3 }
  0x62   : > { %p1473_p13 = pnand %p1471_p12, %p1468_p11 }
  0x64   : > { %1476 = shalt.err (!%p1473_p13)
}
  0x65   : > { %s1477_s12 = scalar_lea.vmem %s265_s14, 64  ;;  %p1485_p7 = scmp.lt.s32.totalorder %s265_s14, %s265_s14 }
  0x66   : > { %p1478_p0 = scmp.ne.s32.totalorder %s265_s14, %s1477_s12  ;;  %p1486_p9 = scmp.lt.s32.totalorder %s1477_s12, %s1477_s12 }
  0x68   : > { %p1480_p2 = pnand %p1478_p0, %p1762_p8  ;;  %p1487_p5 = por %p1486_p9, %p1485_p7 }
  0x6a   : > { %p1481_p4 = pneg %p1480_p2 }
  0x6c   : > { %p1488_p10 = pnand %p1487_p5, %p1481_p4 }
  0x6e   : > { %1491 = shalt.err (!%p1488_p10)
}
  0x6f   : > { %1282 = dma.hbm_to_vmem [thread:$0]  (!%p1746_p6), %s2097_s4, 64, %s265_s14, [#allocation9], %s1651_s10, %s1651_s10, %s1652_s9  }
  0x70   : > { %s1095_s18 = sadd.s32 4294967294, %s1644_s26   ;;  %s40_s13 = sadd.s32 1, %s1640_s25 }
  0x71   : > { %p42_p8 = scmp.ge.s32.totalorder %s40_s13, 2  ;;  %s49_s8 = sadd.s32 1, %s1632_s23 }
  0x72   : > { %p56_p1 = scmp.ne.s32.totalorder %s1632_s23, %s1628_s22  ;;  %p57_p3 = scmp.eq.s32.totalorder %s1644_s26, 0 }
  0x73   : > { %s2129_s13 = smov (%p42_p8, %s40_s13), 0  ;;  %p62_p12 = scmp.ne.s32.totalorder %s1628_s22, %s1624_s21 }
  0x74   : > { %p1851_p11 = por %p57_p3, %p56_p1  ;;  %s44_s10 = ssub.s32 %s1640_s25, %s2129_s13 }
  0x75   : > { %s2112_s9 = sadd.s32 4294967295, %s1644_s26   ;;  %p47_p13 = scmp.eq.s32.totalorder %s44_s10, 0 }
  0x76   : > { %p172_p6 = scmp.eq.s32.totalorder %s2112_s9, 1  ;;  %p2113_p0 = scmp.ne.s32.totalorder %s2106_s28, 0 }
  0x77   : > { %p178_p7 = scmp.eq.s32.totalorder %s1095_s18, 1  ;;  %p1298_p5 = scmp.lt.s32.totalorder %s1644_s26, 2 }
  0x78   : > { %p1863_p2 = por %p2113_p0, %p62_p12  ;;  %p1867_p4 = por %p172_p6, %p56_p1 }
  0x79   : > { %s1872_s17 = scalar_select %p47_p13, %s1632_s23, %s49_s8  }
  0x7a   : > { %s2115_s16 = scalar_select %p1867_p4, 1, 0 }
  0x7b   : > { %p1874_p9 = por %p178_p7, %p62_p12  ;;  %s278_s20 = sand.u32 1, %s1632_s23  }
  0x7c   : > { %s1103_s30 = sshll.u32 %s1640_s25, 7  ;;  %s1102_s7 = sshll.u32 %s278_s20, 3 }
  0x7d   : > { %s2116_s19 = scalar_select %p1874_p9, 1, 0 }
  0x7e   : > { %s1884_s27 = scalar_lea.hbm %s2093_s0, %s1103_s30  ;;  %s282_s18 = scalar_lea.vmem [#allocation2], %s1102_s7 }
  0x7f   : > { %s290_s8 = sshll.u32 %s282_s18, 4  ;;  %p1888_p10 = pnand %p1298_p5, %p1851_p11  ;;  %s1892_s8 = int_to_ptr.vmem [resolvable:$true] %s290_s8 }
  0x80   : > { %s279_s9 = scalar_lea.sflag [#allocation3], %s278_s20  ;;  %s1492_s1 = scalar_lea.hbm %s1884_s27, 128 }
  0x81   : > { %p1493_p8 = scmp.ne.s32.totalorder %s1884_s27, %s1492_s1  ;;  %p1494_p1 = pneg %p1888_p10 }
  0x82   : > { %s1497_s15 = scalar_lea.hbm %s2093_s0, 256  ;;  %p1498_p11 = scmp.lt.u32.totalorder %s1884_s27, %s2093_s0 }
  0x83   : > { %p1495_p3 = pnand %p1494_p1, %p1493_p8  ;;  %p1499_p6 = scmp.lt.u32.totalorder %s1497_s15, %s1492_s1 }
  0x84   : > { %p1501_p0 = scmp.lt.u32.totalorder %s1492_s1, %s1884_s27 }
  0x85   : > { %p1496_p12 = pneg %p1495_p3  ;;  %p1500_p13 = por %p1499_p6, %p1498_p11 }
  0x87   : > { %p1502_p7 = por %p1501_p0, %p1500_p13 }
  0x89   : > { %p1503_p5 = pnand %p1502_p7, %p1496_p12 }
  0x8b   : > { %1506 = shalt.err (!%p1503_p5)
}
  0x8c   : > { %s1507_s20 = scalar_lea.vmem %s1892_s8, 128  ;;  %s1654_s18 = smov [#allocation2]  }
  0x8d   : > { %p1508_p8 = scmp.ne.s32.totalorder %s1892_s8, %s1507_s20  ;;  %s1512_s30 = sshll.u32 %s1654_s18, 4  ;;  %s1513_s30 = int_to_ptr.vmem [resolvable:$false] %s1512_s30 }
  0x8e   : > { %s1514_s7 = scalar_lea.vmem %s1513_s30, 256  ;;  %p1515_p4 = scmp.lt.s32.totalorder %s1892_s8, %s1513_s30 }
  0x8f   : > { %p1510_p3 = pnand %p1508_p8, %p1494_p1  ;;  %p1516_p11 = scmp.lt.s32.totalorder %s1514_s7, %s1507_s20 }
  0x91   : > { %p1511_p9 = pneg %p1510_p3  ;;  %p1517_p6 = por %p1516_p11, %p1515_p4 }
  0x93   : > { %p1518_p13 = pnand %p1517_p6, %p1511_p9 }
  0x95   : > { %1521 = shalt.err (!%p1518_p13)
}
  0x96   : > { %1286 = dma.hbm_to_vmem [thread:$0]  (!%p1888_p10), %s1884_s27, 128, %s1892_s8, %s279_s9  }
  0x97   : > { %p2118_p12 = scmp.ne.s32.totalorder %s2107_s29, 0 }
  0x98   : > { %s1922_s1 = sand.u32 (!%p2118_p12), 1, %s1628_s22  }
  0x99   : > { %299 = sbr.rel (%p2118_p12) target bundleno = 454 (0x1c6), region = 40  ;;  %s1105_s15 = sshll.u32 (!%p2118_p12), %s1922_s1, 3 }
  0x9a   : > { %s302_s12 = scalar_lea.sflag (!%p2118_p12), [#allocation3], %s1922_s1  ;;  %s305_s11 = scalar_lea.vmem (!%p2118_p12), [#allocation2], %s1105_s15 }
  0xa0   : > { %1603 = dma.done.wait (%p1863_p2), %s302_s12, 128  }
  0xa1   : > { %1605 = vsyncadd (%p1863_p2), %s302_s12, 4294967168  ;;  %p2119_p4 = scmp.ne.s32.totalorder %s2106_s28, 0 }
  0xa3   : > { %1607 = dma.done.wait (%p2119_p4), [#allocation6], 1088  }
  0xa4   : > { %1609 = vsyncadd (%p2119_p4), [#allocation6], 4294966208 }
  0xa5   : > { %1611 = dma.done.wait (%p2119_p4), [#allocation9], 1088  }
  0xa6   : > { %1613 = vsyncadd (%p2119_p4), [#allocation9], 4294966208  ;;  %v1655_v0 = vmov 0.0   ;;  %vm1656_vm0 = vmmov 0   ;;  %v1364_v1 = vld [vmem:[#allocation5] sm:$0xff]   ;;  %v1366_v3 = vld [vmem:[#allocation5 + $0x8] sm:$0xff]  }
  0xa7   : > { %1184 = vmatprep.subr.bf16.mxu0 %v1655_v0  ;;  %1192 = vmatprep.subr.bf16.mxu1 %v1655_v0  ;;  %v1365_v2 = vld [vmem:[#allocation8] sm:$0xff]   ;;  %v1367_v4 = vld [vmem:[#allocation8 + $0x8] sm:$0xff]   ;;  %vm381_vm1 = vcmask 261120   ;;  %v1369_v8 = vld [vmem:[#allocation8 + $0x10] sm:$0xff]   ;;  %s1110_s28 = sshll.u32 %s1922_s1, 4  ;;  %vm489_vm2 = vcmask 60416  }
  0xa8   : > { %1188 = vmatprep.mubr.msk.bf16.mxu0 %vm1656_vm0, %v1655_v0  ;;  %1196 = vmatprep.mubr.msk.bf16.mxu1 %vm1656_vm0, %v1655_v0  ;;  %v356_v5 = vld [vmem:[%s305_s11] sm:$0xff]  ;;  %v1372_v11 = vld [vmem:[#allocation5 + $0x20] sm:$0xff]   ;;  %v1374_v13 = vld [vmem:[#allocation5 + $0x28] sm:$0xff]   ;;  %s1979_s29 = scalar_lea.vmem [#allocation11], %s1110_s28  ;;  %s1983_s14 = scalar_lea.vmem [#allocation12], %s1110_s28 }
  0xa9   : > { %1185 = vmatpush3.bf16.msra.mxu0 %v1364_v1  ;;  %1193 = vmatpush3.bf16.msra.mxu1 %v1365_v2  ;;  %v357_v6 = vpack.c.bf16 %v356_v5, %v356_v5  ;;  %v1368_v7 = vld [vmem:[#allocation5 + $0x10] sm:$0xff]   ;;  %v1370_v9 = vld [vmem:[#allocation5 + $0x18] sm:$0xff]   ;;  %v1373_v12 = vld [vmem:[#allocation8 + $0x20] sm:$0xff]   ;;  %s921_s27 = sshll.u32 %s1979_s29, 4  ;;  %s938_s8 = sshll.u32 %s1983_s14, 4  ;;  %s1998_s27 = int_to_ptr.vmem [resolvable:$true] %s921_s27  ;;  %s2000_s8 = int_to_ptr.vmem [resolvable:$true] %s938_s8 }
  0xaa   : > { %1186 = vmatprep.subr.bf16.mxu0 %v1655_v0  ;;  %1194 = vmatprep.subr.bf16.mxu1 %v1655_v0  ;;  %v1371_v10 = vld [vmem:[#allocation8 + $0x18] sm:$0xff]   ;;  %v1375_v14 = vld [vmem:[#allocation8 + $0x28] sm:$0xff]   ;;  %v1377_v16 = vld [vmem:[#allocation8 + $0x30] sm:$0xff]   ;;  %s1158_s10 = sshll.u32 %s1636_s24, 8  ;;  %s902_s15 = scalar_lea.sflag [#allocation4], %s1922_s1 }
  0xab   : > { %v1376_v15 = vld [vmem:[#allocation5 + $0x30] sm:$0xff]   ;;  %v1378_v17 = vld [vmem:[#allocation5 + $0x38] sm:$0xff]   ;;  %v1112_v19 = vld [vmem:[#allocation7] ss:$0 sm:$0xff]  ;;  %s2005_s24 = scalar_lea.hbm %s2098_s5, %s1158_s10  ;;  %s2010_s7 = scalar_lea.hbm %s2099_s6, %s1158_s10 }
  0xac   : > { %v1379_v18 = vld [vmem:[#allocation8 + $0x38] sm:$0xff]   ;;  %v1116_v20 = vld [vmem:[#allocation10] ss:$0 sm:$0xff]  ;;  %v1124_v34 = vld [vmem:[#allocation10 + $0x1] ss:$0 sm:$0xff]  ;;  %s1522_s12 = scalar_lea.vmem %s1998_s27, 256 }
  0xad   : > { %1187 = vmatpush3.bf16.msra.mxu0 %v1366_v3  ;;  %1195 = vmatpush3.bf16.msra.mxu1 %v1367_v4  ;;  %v1120_v33 = vld [vmem:[#allocation7 + $0x1] ss:$0 sm:$0xff]  ;;  %v1130_v47 = vld [vmem:[#allocation7 + $0x2] ss:$0 sm:$0xff]  ;;  %v1134_v48 = vld [vmem:[#allocation10 + $0x2] ss:$0 sm:$0xff]  ;;  %p1523_p2 = scmp.ne.s32.totalorder %s1998_s27, %s1522_s12 }
  0xae   : > { %1200 = vmatprep.subr.bf16.mxu0 %v1655_v0  ;;  %1208 = vmatprep.subr.bf16.mxu1 %v1655_v0  ;;  %v1140_v61 = vld [vmem:[#allocation7 + $0x3] ss:$0 sm:$0xff]  ;;  %v1144_v62 = vld [vmem:[#allocation10 + $0x3] ss:$0 sm:$0xff]  ;;  %p2120_p9 = scmp.ne.s32.totalorder %s2115_s16, 0  ;;  %s1657_s11 = smov [#allocation11]  }
  0xaf   : > { %s1526_s28 = sshll.u32 %s1657_s11, 4  ;;  %s1527_s28 = int_to_ptr.vmem [resolvable:$false] %s1526_s28 }
  0xb0   : > { %1189 = vmatmul.mubr.msk.bf16.vlgmr.msra.gmra.mrb[0].mxu0 %vm381_vm1, %v357_v6  ;;  %1197 = vmatmul.mubr.msk.bf16.vlgmr.msra.gmra.mrb[0].mxu1 %vm381_vm1, %v357_v6  ;;  %p1524_p10 = pnand %p1523_p2, %p2120_p9  ;;  %s1528_s9 = scalar_lea.vmem %s1527_s28, 512 }
  0xb1   : > { %1201 = vmatpush3.bf16.msra.mxu0 %v1368_v7  ;;  %1209 = vmatpush3.bf16.msra.mxu1 %v1369_v8  ;;  %p1529_p0 = scmp.lt.s32.totalorder %s1998_s27, %s1527_s28  ;;  %p1530_p7 = scmp.lt.s32.totalorder %s1528_s9, %s1522_s12 }
  0xb2   : > { %1202 = vmatprep.subr.bf16.mxu0 %v1655_v0  ;;  %1210 = vmatprep.subr.bf16.mxu1 %v1655_v0  ;;  %p1525_p1 = pneg %p1524_p10 }
  0xb3   : > { %1204 = vmatprep.mubr.msk.bf16.mxu0 %vm1656_vm0, %v1655_v0  ;;  %1212 = vmatprep.mubr.msk.bf16.mxu1 %vm1656_vm0, %v1655_v0  ;;  %p1531_p5 = por %p1530_p7, %p1529_p0 }
  0xb5   : > { %1203 = vmatpush3.bf16.msra.mxu0 %v1370_v9  ;;  %1211 = vmatpush3.bf16.msra.mxu1 %v1371_v10  ;;  %p1532_p8 = pnand %p1531_p5, %p1525_p1 }
  0xb6   : > { %1216 = vmatprep.subr.bf16.mxu0 %v1655_v0  ;;  %1224 = vmatprep.subr.bf16.mxu1 %v1655_v0 }
  0xb8   : > { %1205 = vmatmul.mubr.msk.bf16.vlgmr.msra.gmra.mrb[4].mxu0 %vm381_vm1, %v357_v6  ;;  %1213 = vmatmul.mubr.msk.bf16.vlgmr.msra.gmra.mrb[4].mxu1 %vm381_vm1, %v357_v6 }
  0xb9   : > { %1217 = vmatpush3.bf16.msra.mxu0 %v1372_v11  ;;  %1225 = vmatpush3.bf16.msra.mxu1 %v1373_v12 }
  0xba   : > { %1218 = vmatprep.subr.bf16.mxu0 %v1655_v0  ;;  %1226 = vmatprep.subr.bf16.mxu1 %v1655_v0 }
  0xbb   : > { %1220 = vmatprep.mubr.msk.bf16.mxu0 %vm1656_vm0, %v1655_v0  ;;  %1228 = vmatprep.mubr.msk.bf16.mxu1 %vm1656_vm0, %v1655_v0 }
  0xbd   : > { %1219 = vmatpush3.bf16.msra.mxu0 %v1374_v13  ;;  %1227 = vmatpush3.bf16.msra.mxu1 %v1375_v14 }
  0xbe   : > { %1232 = vmatprep.subr.bf16.mxu0 %v1655_v0  ;;  %1240 = vmatprep.subr.bf16.mxu1 %v1655_v0 }
  0xc0   : > { %1221 = vmatmul.mubr.msk.bf16.vlgmr.msra.gmra.mrb[8].mxu0 %vm381_vm1, %v357_v6  ;;  %1229 = vmatmul.mubr.msk.bf16.vlgmr.msra.gmra.mrb[8].mxu1 %vm381_vm1, %v357_v6 }
  0xc1   : > { %1233 = vmatpush3.bf16.msra.mxu0 %v1376_v15  ;;  %1241 = vmatpush3.bf16.msra.mxu1 %v1377_v16 }
  0xc2   : > { %1234 = vmatprep.subr.bf16.mxu0 %v1655_v0  ;;  %1242 = vmatprep.subr.bf16.mxu1 %v1655_v0 }
  0xc3   : > { %1236 = vmatprep.mubr.msk.bf16.mxu0 %vm1656_vm0, %v1655_v0  ;;  %1244 = vmatprep.mubr.msk.bf16.mxu1 %vm1656_vm0, %v1655_v0 }
  0xc5   : > { %1235 = vmatpush3.bf16.msra.mxu0 %v1378_v17  ;;  %1243 = vmatpush3.bf16.msra.mxu1 %v1379_v18 }
  0xc8   : > { %1237 = vmatmul.mubr.msk.bf16.vlgmr.msra.gmra.mrb[12].mxu0 %vm381_vm1, %v357_v6  ;;  %1245 = vmatmul.mubr.msk.bf16.vlgmr.msra.gmra.mrb[12].mxu1 %vm381_vm1, %v357_v6 }
 0x183   : > { %v419_v21 = vpop.f32.mrb[0].mxu0  ;;  %v482_v23 = vpop.f32.mrb[0].mxu1 }
 0x184   : > { %v420_v22 = vadd.f32 %v1112_v19, %v419_v21  ;;  %v1190_v24 = vpop.f32.mrb[1].mxu0  ;;  %v483_v25 = vadd.f32 %v1116_v20, %v482_v23  ;;  %v1198_v26 = vpop.f32.mrb[1].mxu1 }
 0x185   : > { %v422_v27 = vpop.f32.mrb[2].mxu0  ;;  %v485_v29 = vpop.f32.mrb[2].mxu1 }
 0x186   : > { %v488_v28 = vpack.c.bf16 %v420_v22, %v420_v22  ;;  %v1191_v30 = vpop.f32.mrb[3].mxu0  ;;  %v491_v31 = vpack.c.bf16 %v483_v25, %v483_v25  ;;  %v1199_v32 = vpop.f32.mrb[3].mxu1 }
 0x188   : > { %490 = vst.msk [vmem:[%s1979_s29] sm:$0xf] %vm489_vm2, %v488_v28  ;;  %492 = vst.msk [vmem:[%s1983_s14] sm:$0xf] %vm489_vm2, %v491_v31 }
 0x18b   : > { %v552_v35 = vpop.f32.mrb[4].mxu0  ;;  %v617_v37 = vpop.f32.mrb[4].mxu1 }
 0x18c   : > { %v553_v36 = vadd.f32 %v1120_v33, %v552_v35  ;;  %v1206_v38 = vpop.f32.mrb[5].mxu0  ;;  %v618_v39 = vadd.f32 %v1124_v34, %v617_v37  ;;  %v1214_v40 = vpop.f32.mrb[5].mxu1 }
 0x18d   : > { %v555_v41 = vpop.f32.mrb[6].mxu0  ;;  %v620_v43 = vpop.f32.mrb[6].mxu1 }
 0x18e   : > { %v623_v42 = vpack.c.bf16 %v553_v36, %v553_v36  ;;  %v1207_v44 = vpop.f32.mrb[7].mxu0  ;;  %v626_v45 = vpack.c.bf16 %v618_v39, %v618_v39  ;;  %v1215_v46 = vpop.f32.mrb[7].mxu1 }
 0x190   : > { %1128 = vst.msk [vmem:[%s1979_s29 + $0x4] sm:$0xf] %vm489_vm2, %v623_v42  ;;  %1129 = vst.msk [vmem:[%s1983_s14 + $0x4] sm:$0xf] %vm489_vm2, %v626_v45 }
 0x193   : > { %v688_v49 = vpop.f32.mrb[8].mxu0  ;;  %v753_v51 = vpop.f32.mrb[8].mxu1 }
 0x194   : > { %v689_v50 = vadd.f32 %v1130_v47, %v688_v49  ;;  %v1222_v52 = vpop.f32.mrb[9].mxu0  ;;  %v754_v53 = vadd.f32 %v1134_v48, %v753_v51  ;;  %v1230_v54 = vpop.f32.mrb[9].mxu1 }
 0x195   : > { %v691_v55 = vpop.f32.mrb[10].mxu0  ;;  %v756_v57 = vpop.f32.mrb[10].mxu1 }
 0x196   : > { %v759_v56 = vpack.c.bf16 %v689_v50, %v689_v50  ;;  %v1223_v58 = vpop.f32.mrb[11].mxu0  ;;  %v762_v59 = vpack.c.bf16 %v754_v53, %v754_v53  ;;  %v1231_v60 = vpop.f32.mrb[11].mxu1 }
 0x198   : > { %1138 = vst.msk [vmem:[%s1979_s29 + $0x8] sm:$0xf] %vm489_vm2, %v759_v56  ;;  %1139 = vst.msk [vmem:[%s1983_s14 + $0x8] sm:$0xf] %vm489_vm2, %v762_v59 }
 0x19b   : > { %v824_v63 = vpop.f32.mrb[12].mxu0  ;;  %v889_v1 = vpop.f32.mrb[12].mxu1 }
 0x19c   : > { %v825_v0 = vadd.f32 %v1140_v61, %v824_v63  ;;  %v1238_v2 = vpop.f32.mrb[13].mxu0  ;;  %v890_v3 = vadd.f32 %v1144_v62, %v889_v1  ;;  %v1246_v4 = vpop.f32.mrb[13].mxu1 }
 0x19d   : > { %v827_v5 = vpop.f32.mrb[14].mxu0  ;;  %v892_v7 = vpop.f32.mrb[14].mxu1 }
 0x19e   : > { %v895_v6 = vpack.c.bf16 %v825_v0, %v825_v0  ;;  %v1239_v8 = vpop.f32.mrb[15].mxu0  ;;  %v898_v9 = vpack.c.bf16 %v890_v3, %v890_v3  ;;  %v1247_v10 = vpop.f32.mrb[15].mxu1 }
 0x1a0   : > { %1148 = vst.msk [vmem:[%s1979_s29 + $0xc] sm:$0xf] %vm489_vm2, %v895_v6  ;;  %1149 = vst.msk [vmem:[%s1983_s14 + $0xc] sm:$0xf] %vm489_vm2, %v898_v9 }
 0x1a1   : > { %1535 = shalt.err (!%p1532_p8)
}
 0x1a2   : > { %s1536_s29 = scalar_lea.hbm %s2005_s24, 256  ;;  %s1540_s20 = scalar_lea.hbm %s2098_s5, 512 }
 0x1a3   : > { %p1537_p3 = scmp.ne.s32.totalorder %s2005_s24, %s1536_s29  ;;  %p1541_p13 = scmp.lt.u32.totalorder %s2005_s24, %s2098_s5 }
 0x1a4   : > { %p1542_p12 = scmp.lt.u32.totalorder %s1540_s20, %s1536_s29  ;;  %p1544_p2 = scmp.lt.u32.totalorder %s1536_s29, %s2005_s24 }
 0x1a5   : > { %p1538_p11 = pnand %p1537_p3, %p2120_p9 }
 0x1a6   : > { %p1543_p4 = por %p1542_p12, %p1541_p13 }
 0x1a7   : > { %p1539_p6 = pneg %p1538_p11 }
 0x1a8   : > { %p1545_p10 = por %p1544_p2, %p1543_p4 }
 0x1aa   : > { %p1546_p1 = pnand %p1545_p10, %p1539_p6 }
 0x1ac   : > { %1549 = shalt.err (!%p1546_p1)
}
 0x1ad   : > { %s1658_s12 = smov 64   ;;  %s1659_s11 = smov 4  }
 0x1ae   : > { %1266 = dma.vmem_to_hbm [thread:$0]  (%p2120_p9), %s1998_s27, 256, %s2005_s24, %s902_s15, %s1658_s12, %s1658_s12, %s1659_s11  }
 0x1af   : > { %s907_s28 = scalar_lea.sflag [#allocation13], %s1922_s1  ;;  %s1550_s9 = scalar_lea.vmem %s2000_s8, 256 }
 0x1b0   : > { %p1551_p0 = scmp.ne.s32.totalorder %s2000_s8, %s1550_s9  ;;  %s1660_s29 = smov [#allocation12]  }
 0x1b1   : > { %s1554_s14 = sshll.u32 %s1660_s29, 4  ;;  %s1555_s14 = int_to_ptr.vmem [resolvable:$false] %s1554_s14 }
 0x1b2   : > { %p1552_p7 = pnand %p1551_p0, %p2120_p9  ;;  %s1556_s10 = scalar_lea.vmem %s1555_s14, 512 }
 0x1b3   : > { %p1557_p8 = scmp.lt.s32.totalorder %s2000_s8, %s1555_s14  ;;  %p1558_p3 = scmp.lt.s32.totalorder %s1556_s10, %s1550_s9 }
 0x1b4   : > { %p1553_p5 = pneg %p1552_p7 }
 0x1b5   : > { %p1559_p11 = por %p1558_p3, %p1557_p8 }
 0x1b7   : > { %p1560_p6 = pnand %p1559_p11, %p1553_p5 }
 0x1b9   : > { %1563 = shalt.err (!%p1560_p6)
}
 0x1ba   : > { %s1564_s27 = scalar_lea.hbm %s2010_s7, 256  ;;  %s1568_s20 = scalar_lea.hbm %s2099_s6, 512 }
 0x1bb   : > { %p1565_p13 = scmp.ne.s32.totalorder %s2010_s7, %s1564_s27  ;;  %p1569_p2 = scmp.lt.u32.totalorder %s2010_s7, %s2099_s6 }
 0x1bc   : > { %p1570_p10 = scmp.lt.u32.totalorder %s1568_s20, %s1564_s27  ;;  %p1572_p0 = scmp.lt.u32.totalorder %s1564_s27, %s2010_s7 }
 0x1bd   : > { %p1566_p12 = pnand %p1565_p13, %p2120_p9 }
 0x1be   : > { %p1571_p1 = por %p1570_p10, %p1569_p2 }
 0x1bf   : > { %p1567_p4 = pneg %p1566_p12 }
 0x1c0   : > { %p1573_p7 = por %p1572_p0, %p1571_p1 }
 0x1c2   : > { %p1574_p5 = pnand %p1573_p7, %p1567_p4 }
 0x1c4   : > { %1577 = shalt.err (!%p1574_p5)
}
 0x1c5   : > { %1267 = dma.vmem_to_hbm [thread:$0]  (%p2120_p9), %s2000_s8, 256, %s2010_s7, %s907_s28, %s1658_s12, %s1658_s12, %s1659_s11  }
 0x1c6 PF: > { %s953_s9 = sand.u32 1, %s1624_s21   ;;  %p2121_p8 = scmp.ne.s32.totalorder %s2116_s19, 0 }
 0x1c7   : > { %p2122_p3 = scmp.ge.s32.totalorder %s1644_s26, 2  ;;  %s954_s29 = scalar_lea.sflag [#allocation4], %s953_s9 }
 0x1c9   : > { %p1288_p11 = pnand %p2122_p3, %p2121_p8 }
 0x1cb   : > { %1615 = dma.done.wait (!%p1288_p11), %s954_s29, 256  }
 0x1cc   : > { %1617 = vsyncadd (!%p1288_p11), %s954_s29, 4294967040  ;;  %s963_s16 = scalar_lea.sflag [#allocation13], %s953_s9 }
 0x1cd   : > { %1619 = dma.done.wait (!%p1288_p11), %s963_s16, 256  }
 0x1ce   : > { %1621 = vsyncadd (!%p1288_p11), %s963_s16, 4294967040  ;;  %s28_s26 = sadd.s32 1, %s1644_s26   ;;  %s2123_s21 = smov %s1628_s22 }
 0x1cf   : > { %p25_p6 = scmp.ge.s32.totalorder %s28_s26, 4   ;;  %s2124_s22 = smov %s1632_s23 }
 0x1d0   : > { %s2125_s23 = smov %s1872_s17  ;;  %s2126_s24 = smov %s1640_s25 }
 0x1d1   : > { %s2127_s25 = smov %s2129_s13  ;;  %27 = sbr.rel (!%p25_p6) target bundleno = 12 (0xc), region = 136 }
 0x1d8   :  { %968 = vsyncpa [#allocation3], 1 }
 0x1d9   :  { %970 = vsyncpa [#allocation3 + $0x1], 1 }
 0x1da   :  { %971 = vsyncpa [#allocation6], 1 }
 0x1db   :  { %972 = vsyncpa [#allocation9], 1 }
 0x1dc   :  { %973 = vsyncpa [#allocation4], 1 }
 0x1dd   :  { %975 = vsyncpa [#allocation4 + $0x1], 1 }
 0x1de   :  { %976 = vsyncpa [#allocation13], 1 }
 0x1df   :  { %978 = vsyncpa [#allocation13 + $0x1], 1 }

</bundles_post_ra>
